<compile_context>
chip_gen: v7x
topology: tpu7x:2x2x1
jax: 0.10.0
libtpu: 0.0.40
codegen_flags: <defaults>
</compile_context>

<pallas_src>
import functools

import jax
import jax.numpy as jnp
from jax import lax
from jax.experimental import pallas as pl
from jax.experimental.pallas import tpu as pltpu

NEG_SLOPE = 0.2      # GATv2Conv default negative_slope
NEG_INF = -1e30


def _round_up(x, m):
    return (x + m - 1) // m * m


def _choose_tiles(n):
    """(padded N, dst tile, src tile). Small graphs: single tile.
    Large graphs: 256 x 512 (fits comfortably in VMEM with double buffering
    on v5e/v6e/v7x while amortizing the ~0.35us per-grid-step overhead)."""
    n_pad = _round_up(max(n, 1), 128)
    if n_pad <= 512:
        return n_pad, n_pad, n_pad
    n_pad = _round_up(n, 512)
    return n_pad, 256, 512


# ---------------------------------------------------------------------------
# Projection kernel: one fused matmul for lin_l | lin_r.
# ---------------------------------------------------------------------------
def _proj_kernel(x_ref, w_ref, b_ref, out_ref):
    x = x_ref[...].astype(jnp.bfloat16)
    w = w_ref[...].astype(jnp.bfloat16)
    out_ref[...] = jnp.dot(x, w, preferred_element_type=jnp.float32) + b_ref[...]


def _project(x, w, b):
    n, f = x.shape
    k = w.shape[1]
    t = 256 if n % 256 == 0 else 128
    return pl.pallas_call(
        _proj_kernel,
        out_shape=jax.ShapeDtypeStruct((n, k), jnp.float32),
        grid=(n // t,),
        in_specs=[
            pl.BlockSpec((t, f), lambda i: (i, 0)),
            pl.BlockSpec((f, k), lambda i: (0, 0)),
            pl.BlockSpec((1, k), lambda i: (0, 0)),
        ],
        out_specs=pl.BlockSpec((t, k), lambda i: (i, 0)),
        compiler_params=pltpu.CompilerParams(dimension_semantics=("parallel",)),
    )(x, w, b)


# ---------------------------------------------------------------------------
# Attention kernel: tiled masked GATv2 attention with online softmax.
# ---------------------------------------------------------------------------
def _gat_attn_kernel(xr_ref, xlt_ref, xl_ref, ar_ref, alt_ref, adj_ref,
                     bias_ref, attc_ref, nnz_ref, out_ref,
                     m_ref, l_ref, acc_ref, *, num_heads, out_dim):
    i = pl.program_id(0)          # dst tile
    j = pl.program_id(1)          # src tile (reduction axis, "arbitrary")
    hd = num_heads * out_dim

    @pl.when(j == 0)
    def _init():
        m_ref[...] = jnp.full_like(m_ref, NEG_INF)
        l_ref[...] = jnp.zeros_like(l_ref)
        acc_ref[...] = jnp.zeros_like(acc_ref)

    @pl.when(nnz_ref[i, j] > 0)              # skip blocks with no edges
    def _accumulate():
        cnt = adj_ref[...].astype(jnp.float32)        # [Td, Ts] edge multiplicity
        has_edge = cnt > 0.0
        xr = xr_ref[...]                              # [Td, H*D]  dst / lin_r
        xlt = xlt_ref[...]                            # [H*D, Ts]  src / lin_l (transposed)
        xl = xl_ref[...]                              # [Ts, H*D]
        ar = ar_ref[...]                              # [Td, H]  0.2 * att . xr   (precomputed)
        alt = alt_ref[...]                            # [H, Ts]  0.2 * att . xl   (precomputed)

        for h in range(num_heads):
            base = h * out_dim
            # Linear part of leaky_relu (precomputed per node): one broadcast add.
            s = ar[:, h:h + 1] + alt[h:h + 1, :]      # [Td, Ts]
            # Nonlinear part: 0.8 * sum_d att[h,d] * relu(xr_i[d] + xl_j[d]).
            for d in range(out_dim):
                col = xr[:, base + d:base + d + 1]    # [Td, 1]
                row = xlt[base + d:base + d + 1, :]   # [1, Ts]
                s = s + attc_ref[base + d] * jnp.maximum(col + row, 0.0)

            logits = jnp.where(has_edge, s, NEG_INF)
            m_prev = m_ref[h]                                          # [Td, 1]
            m_new = jnp.maximum(m_prev, jnp.max(logits, axis=-1, keepdims=True))
            corr = jnp.exp(m_prev - m_new)
            # multiplying by the count reproduces PyG softmax over duplicate edges
            p = jnp.exp(logits - m_new) * cnt                          # [Td, Ts]
            l_ref[h] = corr * l_ref[h] + jnp.sum(p, axis=-1, keepdims=True)
            xl_h = xl[:, base:base + out_dim]                          # [Ts, D]
            pv = jnp.dot(p.astype(jnp.bfloat16), xl_h.astype(jnp.bfloat16),
                         preferred_element_type=jnp.float32)           # [Td, D]
            acc_ref[:, base:base + out_dim] = (
                corr * acc_ref[:, base:base + out_dim] + pv)
            m_ref[h] = m_new

    @pl.when(j == pl.num_programs(1) - 1)
    def _finalize():
        t_dst = acc_ref.shape[0]
        col_head = lax.broadcasted_iota(jnp.int32, (t_dst, hd), 1) // out_dim
        inv_full = jnp.zeros((t_dst, hd), jnp.float32)
        for h in range(num_heads):
            l_h = l_ref[h]
            inv_h = pl.reciprocal(l_h, approx=True)
            inv_h = jnp.where(l_h > 0.0, inv_h, 0.0)   # isolated nodes -> bias only
            inv_full = jnp.where(col_head == h, inv_h, inv_full)
        # single lane-dense [Td, H*D] store
        out_ref[...] = acc_ref[...] * inv_full + bias_ref[...]


def gatv2_layer(x_pad, adj, nnz, params, *, num_heads, t_dst, t_src):
    n_pad = x_pad.shape[0]
    hd = params["bias"].shape[1]
    out_dim = hd // num_heads

    proj = _project(x_pad, params["w"], params["b"])    # [n_pad, 2*H*D]
    xl = proj[:, :hd]                                   # source side (lin_l)
    xr = proj[:, hd:]                                   # target side (lin_r)
    xlt = jnp.transpose(xl)                             # [H*D, n_pad]  layout plumbing

    att = params["att"]                                 # [H, D]
    # Precompute the linear part of leaky_relu once per node (cheap O(N*H*D)).
    ar = NEG_SLOPE * jnp.einsum(
        "nhd,hd->nh", xr.reshape(n_pad, num_heads, out_dim), att)      # [N, H]
    al = NEG_SLOPE * jnp.einsum(
        "nhd,hd->nh", xl.reshape(n_pad, num_heads, out_dim), att)      # [N, H]
    alt = jnp.transpose(al)                                            # [H, N]
    att_c = ((1.0 - NEG_SLOPE) * att).reshape(-1)        # [H*D] SMEM scalars

    kernel = functools.partial(
        _gat_attn_kernel, num_heads=num_heads, out_dim=out_dim)
    grid = (n_pad // t_dst, n_pad // t_src)

    return pl.pallas_call(
        kernel,
        out_shape=jax.ShapeDtypeStruct((n_pad, hd), jnp.float32),
        grid=grid,
        in_specs=[
            pl.BlockSpec((t_dst, hd), lambda i, j: (i, 0)),           # xr (dst rows)
            pl.BlockSpec((hd, t_src), lambda i, j: (0, j)),           # xl^T (src cols)
            pl.BlockSpec((t_src, hd), lambda i, j: (j, 0)),           # xl (src rows)
            pl.BlockSpec((t_dst, num_heads), lambda i, j: (i, 0)),    # 0.2*att.xr
            pl.BlockSpec((num_heads, t_src), lambda i, j: (0, j)),    # (0.2*att.xl)^T
            pl.BlockSpec((t_dst, t_src), lambda i, j: (i, j)),        # adj counts int8
            pl.BlockSpec((1, hd), lambda i, j: (0, 0)),               # bias
            pl.BlockSpec(memory_space=pltpu.MemorySpace.SMEM),        # 0.8*att [H*D]
            pl.BlockSpec(memory_space=pltpu.MemorySpace.SMEM),        # per-block nnz
        ],
        out_specs=pl.BlockSpec((t_dst, hd), lambda i, j: (i, 0)),
        scratch_shapes=[
            pltpu.VMEM((num_heads, t_dst, 1), jnp.float32),           # running max
            pltpu.VMEM((num_heads, t_dst, 1), jnp.float32),           # running sum
            pltpu.VMEM((t_dst, hd), jnp.float32),                     # running numerator
        ],
        compiler_params=pltpu.CompilerParams(
            dimension_semantics=("parallel", "arbitrary")),
    )(xr, xlt, xl, ar, alt, adj, params["bias"], att_c, nnz)


# ---------------------------------------------------------------------------
# Graph preprocessing (plain JAX).
# ---------------------------------------------------------------------------
def dense_adjacency_counts(edge_index, n_pad):
    """adj[dst, src] = #edges src->dst (PyG edge_index = [src; dst])."""
    src, dst = edge_index[0], edge_index[1]
    adj = jnp.zeros((n_pad, n_pad), jnp.int32).at[dst, src].add(1)
    # TODO(synk): int8 saturates at 127 duplicate edges per (src, dst) pair.
    return jnp.minimum(adj, 127).astype(jnp.int8)


def block_edge_counts(adj, t_dst, t_src):
    nd, ns = adj.shape[0] // t_dst, adj.shape[1] // t_src
    blocks = adj.astype(jnp.int32).reshape(nd, t_dst, ns, t_src)
    return blocks.sum(axis=(1, 3)).astype(jnp.int32)


def _glorot(key, shape):
    fan_in, fan_out = shape[0], shape[-1]
    limit = (6.0 / (fan_in + fan_out)) ** 0.5
    return jax.random.uniform(key, shape, jnp.float32, -limit, limit)


class GATModulePallas:
    """Stack of GATv2Conv(hidden, hidden//heads, heads=heads, add_self_loops=False)."""

    def __init__(self, hidden_dims, num_heads, num_layers, key):
        assert hidden_dims % num_heads == 0
        out_dim = hidden_dims // num_heads
        self.num_heads = num_heads
        self.params = []
        for layer in range(num_layers):
            k = jax.random.fold_in(key, layer)
            k_wl, k_wr, k_att = jax.random.split(k, 3)
            wl = _glorot(k_wl, (hidden_dims, num_heads * out_dim))
            wr = _glorot(k_wr, (hidden_dims, num_heads * out_dim))
            self.params.append({
                "w": jnp.concatenate([wl, wr], axis=1),            # fused lin_l | lin_r
                "b": jnp.zeros((1, 2 * num_heads * out_dim), jnp.float32),
                "att": _glorot(k_att, (num_heads, out_dim)),
                "bias": jnp.zeros((1, num_heads * out_dim), jnp.float32),
            })

    def __call__(self, x_dict, edge_index_dict):
        # TODO(synk): only homogeneous (ntype, 'to', ntype) relations are handled;
        # full heterogeneous cross-type message passing is not modeled.
        out = {}
        for ntype, x in x_dict.items():
            n = x.shape[0]
            n_pad, t_dst, t_src = _choose_tiles(n)
            adj = dense_adjacency_counts(
                edge_index_dict[(ntype, "to", ntype)], n_pad)
            nnz = block_edge_counts(adj, t_dst, t_src)
            h = jnp.pad(x, ((0, n_pad - n), (0, 0)))
            for layer_params in self.params:
                h = gatv2_layer(h, adj, nnz, layer_params,
                                num_heads=self.num_heads,
                                t_dst=t_dst, t_src=t_src)
            out[ntype] = h[:n]
        return out


# ---------------------------------------------------------------------------
# Pure-JAX reference (same bf16 matmul policy) for self-checking.
# ---------------------------------------------------------------------------
def _reference_layer(x, cnt, params, num_heads):
    hd = params["bias"].shape[1]
    d = hd // num_heads
    proj = jnp.dot(x.astype(jnp.bfloat16), params["w"].astype(jnp.bfloat16),
                   preferred_element_type=jnp.float32) + params["b"]
    xl, xr = proj[:, :hd], proj[:, hd:]
    mask = cnt > 0
    outs = []
    for h in range(num_heads):
        xl_h = xl[:, h * d:(h + 1) * d]
        xr_h = xr[:, h * d:(h + 1) * d]
        e = xr_h[:, None, :] + xl_h[None, :, :]
        e = jnp.where(e > 0.0, e, NEG_SLOPE * e)
        s = jnp.einsum("ijd,d->ij", e, params["att"][h])
        logits = jnp.where(mask, s, NEG_INF)
        p = jnp.exp(logits - jnp.max(logits, axis=-1, keepdims=True)) * cnt
        denom = jnp.sum(p, axis=-1, keepdims=True)
        num = jnp.dot(p.astype(jnp.bfloat16), xl_h.astype(jnp.bfloat16),
                      preferred_element_type=jnp.float32)
        outs.append(jnp.where(denom > 0, num / denom, 0.0))
    return jnp.concatenate(outs, axis=-1) + params["bias"]


def reference_forward(x, edge_index, params_list, num_heads):
    n = x.shape[0]
    cnt = jnp.zeros((n, n), jnp.float32).at[edge_index[1], edge_index[0]].add(1.0)
    h = x
    for params in params_list:
        h = _reference_layer(h, cnt, params, num_heads)
    return h


if __name__ == "__main__":
    hidden_dims = 32
    num_heads = 4
    num_layers = 2
    num_nodes = 8

    key = jax.random.PRNGKey(0)
    k_x, k_params = jax.random.split(key)

    x = jax.random.normal(k_x, (num_nodes, hidden_dims), jnp.float32)
    # Deterministic ring plus a few chords (PyG layout: row 0 = src, row 1 = dst).
    src = jnp.array([0, 1, 2, 3, 4, 5, 6, 7, 0, 2, 4, 6], jnp.int32)
    dst = jnp.array([1, 2, 3, 4, 5, 6, 7, 0, 4, 6, 0, 2], jnp.int32)
    edge_index = jnp.stack([src, dst], axis=0)

    x_dict = {"node": x}
    edge_index_dict = {("node", "to", "node"): edge_index}

    model = GATModulePallas(hidden_dims, num_heads, num_layers, k_params)
    out = jax.block_until_ready(model(x_dict, edge_index_dict)["node"])

    assert out.shape == (num_nodes, hidden_dims)
    assert bool(jnp.all(jnp.isfinite(out)))

    ref = reference_forward(x, edge_index, model.params, num_heads)
    err = float(jnp.max(jnp.abs(out - ref)))
    assert err < 5e-2, f"mismatch vs reference: max abs err {err}"

    print("KERNEL_OK")
</pallas_src>

<mosaic_0001>
module attributes {stable_mosaic.version = 11 : i64} {
  func.func @_proj_kernel(%arg0: i32, %arg1: memref<128x32xf32, #tpu.memory_space<vmem>>, %arg2: memref<32x64xf32, #tpu.memory_space<vmem>>, %arg3: memref<1x64xf32, #tpu.memory_space<vmem>>, %arg4: memref<128x64xf32, #tpu.memory_space<vmem>>) attributes {dimension_semantics = [#tpu.dimension_semantics<parallel>], iteration_bounds = array<i64: 1>, scalar_prefetch = 0 : i64, scratch_operands = 0 : i64, tpu.core_type = #tpu.core_type<tc>, window_params = [{transform_indices = @transform_0, window_bounds = array<i64: 128, 32>}, {pipeline_mode = #tpu.pipeline_mode<synchronous>, transform_indices = @transform_1, window_bounds = array<i64: 32, 64>}, {pipeline_mode = #tpu.pipeline_mode<synchronous>, transform_indices = @transform_2, window_bounds = array<i64: 1, 64>}, {transform_indices = @transform_3, window_bounds = array<i64: 128, 64>}]} {
    %c0 = arith.constant 0 : index
    %c0_0 = arith.constant 0 : index
    %0 = vector.load %arg1[%c0, %c0_0] : memref<128x32xf32, #tpu.memory_space<vmem>>, vector<128x32xf32>
    %1 = arith.truncf %0 : vector<128x32xf32> to vector<128x32xbf16>
    %c0_1 = arith.constant 0 : index
    %c0_2 = arith.constant 0 : index
    %2 = vector.load %arg2[%c0_1, %c0_2] : memref<32x64xf32, #tpu.memory_space<vmem>>, vector<32x64xf32>
    %3 = arith.truncf %2 : vector<32x64xf32> to vector<32x64xbf16>
    %cst = arith.constant dense<0.000000e+00> : vector<128x64xf32>
    %4 = tpu.matmul %1, %3, %cst {dimension_numbers = #tpu.dot_dimension_numbers<[1], [0], [0], [1], [0, 0, 1, 1], [], []>} : vector<128x32xbf16>, vector<32x64xbf16>, vector<128x64xf32> -> vector<128x64xf32>
    %c0_3 = arith.constant 0 : index
    %c0_4 = arith.constant 0 : index
    %5 = vector.load %arg3[%c0_3, %c0_4] : memref<1x64xf32, #tpu.memory_space<vmem>>, vector<1x64xf32>
    %6 = vector.broadcast %5 : vector<1x64xf32> to vector<128x64xf32>
    %7 = arith.addf %4, %6 : vector<128x64xf32>
    %c0_5 = arith.constant 0 : index
    %c0_6 = arith.constant 0 : index
    %8 = vector.load %arg4[%c0_5, %c0_6] : memref<128x64xf32, #tpu.memory_space<vmem>>, vector<128x64xf32>
    tpu.vector_store %arg4[%c0_5, %c0_6], %7 {strides = array<i32>} : memref<128x64xf32, #tpu.memory_space<vmem>>, vector<128x64xf32>,
    return
  }
  func.func @transform_0(%arg0: i32) -> (i32, i32) {
    %c0_i32 = arith.constant 0 : i32
    %c0_i32_0 = arith.constant 0 : i32
    return %arg0, %c0_i32 : i32, i32
  }
  func.func @transform_1(%arg0: i32) -> (i32, i32) {
    %c0_i32 = arith.constant 0 : i32
    %c0_i32_0 = arith.constant 0 : i32
    %c0_i32_1 = arith.constant 0 : i32
    return %c0_i32, %c0_i32_0 : i32, i32
  }
  func.func @transform_2(%arg0: i32) -> (i32, i32) {
    %c0_i32 = arith.constant 0 : i32
    %c0_i32_0 = arith.constant 0 : i32
    %c0_i32_1 = arith.constant 0 : i32
    return %c0_i32, %c0_i32_0 : i32, i32
  }
  func.func @transform_3(%arg0: i32) -> (i32, i32) {
    %c0_i32 = arith.constant 0 : i32
    %c0_i32_0 = arith.constant 0 : i32
    return %arg0, %c0_i32 : i32, i32
  }
}

</mosaic_0001>

<bundles_post_ra>
// kernel: tpu_custom_call.1
= control target key start
LH: loop header
LB: loop body
LE: loop exit
PB: predicated region body
PF: predicated region fallthrough
CT: control target
= control target key end

     0   :  { %vm52_vm0 = vcmask 261120   ;;  %vm174_vm1 = vcmask 523264   ;;  %s393_s1 = inlined_call_operand.vmem [shape: f32[32,64], index: 1, kind: input, shape index: {}]   ;;  %s394_s0 = inlined_call_operand.vmem [shape: f32[128,32], index: 0, kind: input, shape index: {}]   ;;  %s395_s2 = inlined_call_operand.vmem [shape: f32[1,64], index: 2, kind: input, shape index: {}]   ;;  %s396_s3 = inlined_call_operand.vmem [shape: f32[128,64], index: 3, kind: output, shape index: {}]  }
   0x1   :  { %v39_v0 = vld [vmem:[%s393_s1] sm:$0xff]  ;;  %v40_v1 = vld [vmem:[%s393_s1 + $0x8] sm:$0xff]  ;;  %v41_v2 = vld [vmem:[%s393_s1 + $0x10] sm:$0xff] }
   0x2   :  { %v43_v3 = vpack.c.bf16 %v40_v1, %v39_v0  ;;  %v42_v4 = vld [vmem:[%s393_s1 + $0x18] sm:$0xff]  ;;  %v15_v5 = vld [vmem:[%s394_s0] sm:$0xff]  ;;  %v16_v6 = vld [vmem:[%s394_s0 + $0x8] sm:$0xff] }
   0x3   :  { %v44_v7 = vpack.c.bf16 %v42_v4, %v41_v2  ;;  %v31_v8 = vpack.c.bf16 %v16_v6, %v15_v5  ;;  %v23_v9 = vld [vmem:[%s394_s0 + $0x40] sm:$0xff]  ;;  %v24_v10 = vld [vmem:[%s394_s0 + $0x48] sm:$0xff]  ;;  %v17_v12 = vld [vmem:[%s394_s0 + $0x10] sm:$0xff] }
   0x4   :  { %214 = vmatprep.subr.bf16.mxu0 %v43_v3  ;;  %234 = vmatprep.subr.bf16.mxu1 %v43_v3  ;;  %v35_v11 = vpack.c.bf16 %v24_v10, %v23_v9  ;;  %v18_v13 = vld [vmem:[%s394_s0 + $0x18] sm:$0xff]  ;;  %v25_v14 = vld [vmem:[%s394_s0 + $0x50] sm:$0xff]  ;;  %v19_v16 = vld [vmem:[%s394_s0 + $0x20] sm:$0xff] }
   0x5   :  { %215 = vmatpush3.bf16.msra.mxu0 %v43_v3  ;;  %236 = vmatpush3.bf16.msra.mxu1 %v43_v3  ;;  %v26_v15 = vld [vmem:[%s394_s0 + $0x58] sm:$0xff]  ;;  %v20_v17 = vld [vmem:[%s394_s0 + $0x28] sm:$0xff]  ;;  %v27_v18 = vld [vmem:[%s394_s0 + $0x60] sm:$0xff]  ;;  %v32_v20 = vpack.c.bf16 %v18_v13, %v17_v12 }
   0x6   :  { %216 = vmatprep.subr.bf16.mxu0 %v44_v7  ;;  %235 = vmatprep.subr.bf16.mxu1 %v44_v7  ;;  %v28_v19 = vld [vmem:[%s394_s0 + $0x68] sm:$0xff]  ;;  %v36_v21 = vpack.c.bf16 %v26_v15, %v25_v14  ;;  %v33_v22 = vpack.c.bf16 %v20_v17, %v19_v16  ;;  %v21_v24 = vld [vmem:[%s394_s0 + $0x30] sm:$0xff]  ;;  %v22_v25 = vld [vmem:[%s394_s0 + $0x38] sm:$0xff] }
   0x7   :  { %218 = vmatprep.mubr.msk.bf16.mxu0 %vm52_vm0, %v31_v8  ;;  %226 = vmatprep.mubr.msk.bf16.mxu1 %vm52_vm0, %v35_v11  ;;  %v37_v23 = vpack.c.bf16 %v28_v19, %v27_v18  ;;  %v29_v26 = vld [vmem:[%s394_s0 + $0x70] sm:$0xff]  ;;  %v30_v27 = vld [vmem:[%s394_s0 + $0x78] sm:$0xff]  ;;  %v34_v28 = vpack.c.bf16 %v22_v25, %v21_v24  ;;  %v195_v30 = vld [vmem:[%s395_s2] ss:$0 sm:$0xff] }
   0x8   :  { %v38_v29 = vpack.c.bf16 %v30_v27, %v29_v26 }
   0x9   :  { %217 = vmatpush3.bf16.msra.mxu0 %v44_v7  ;;  %237 = vmatpush3.bf16.msra.mxu1 %v44_v7 }
   0xc   :  { %219 = vmatmul.mubr.msk.bf16.vlgmr.msra.gmra.mrb[0].mxu0 %vm52_vm0, %v32_v20  ;;  %227 = vmatmul.mubr.msk.bf16.vlgmr.msra.gmra.mrb[0].mxu1 %vm52_vm0, %v36_v21 }
   0xd   :  { %222 = vmatprep.mubr.msk.bf16.mxu0 %vm52_vm0, %v33_v22  ;;  %230 = vmatprep.mubr.msk.bf16.mxu1 %vm52_vm0, %v37_v23 }
  0x14   :  { %223 = vmatmul.mubr.msk.bf16.gmra.mrb[4].mxu0 %vm52_vm0, %v34_v28  ;;  %231 = vmatmul.mubr.msk.bf16.gmra.mrb[4].mxu1 %vm52_vm0, %v38_v29 }
  0xdf   :  { %v220_v31 = vpop.f32.mrb[0].mxu0  ;;  %v228_v32 = vpop.f32.mrb[0].mxu1 }
  0xe0   :  { %v120_v33 = vadd.f32 %v220_v31, %v195_v30  ;;  %v152_v34 = vadd.f32 %v228_v32, %v195_v30  ;;  %v111_v35 = vpop.f32.mrb[1].mxu0  ;;  %v143_v36 = vpop.f32.mrb[1].mxu1 }
  0xe1   :  { %v112_v37 = vadd.f32 %v195_v30, %v111_v35  ;;  %v144_v38 = vadd.f32 %v195_v30, %v143_v36  ;;  %v221_v39 = vpop.f32.mrb[2].mxu0  ;;  %v229_v40 = vpop.f32.mrb[2].mxu1 }
  0xe2   :  { %177 = vst.msk [vmem:[%s396_s3 + $0x10] sm:$0xff] %vm174_vm1, %v120_v33  ;;  %185 = vst.msk [vmem:[%s396_s3 + $0x50] sm:$0xff] %vm174_vm1, %v152_v34  ;;  %v123_v41 = vadd.f32 %v221_v39, %v195_v30  ;;  %v155_v42 = vadd.f32 %v229_v40, %v195_v30  ;;  %v114_v43 = vpop.f32.mrb[3].mxu0  ;;  %v146_v44 = vpop.f32.mrb[3].mxu1 }
  0xe3   :  { %175 = vst.msk [vmem:[%s396_s3] sm:$0xff] %vm174_vm1, %v112_v37  ;;  %183 = vst.msk [vmem:[%s396_s3 + $0x40] sm:$0xff] %vm174_vm1, %v144_v38  ;;  %v115_v45 = vadd.f32 %v195_v30, %v114_v43  ;;  %v147_v46 = vadd.f32 %v195_v30, %v146_v44 }
  0xe4   :  { %178 = vst.msk [vmem:[%s396_s3 + $0x18] sm:$0xff] %vm174_vm1, %v123_v41  ;;  %186 = vst.msk [vmem:[%s396_s3 + $0x58] sm:$0xff] %vm174_vm1, %v155_v42 }
  0xe5   :  { %176 = vst.msk [vmem:[%s396_s3 + $0x8] sm:$0xff] %vm174_vm1, %v115_v45  ;;  %184 = vst.msk [vmem:[%s396_s3 + $0x48] sm:$0xff] %vm174_vm1, %v147_v46 }
  0xe7   :  { %v224_v47 = vpop.f32.mrb[4].mxu0  ;;  %v232_v48 = vpop.f32.mrb[4].mxu1 }
  0xe8   :  { %v136_v49 = vadd.f32 %v224_v47, %v195_v30  ;;  %v168_v50 = vadd.f32 %v232_v48, %v195_v30  ;;  %v127_v51 = vpop.f32.mrb[5].mxu0  ;;  %v159_v52 = vpop.f32.mrb[5].mxu1 }
  0xe9   :  { %v128_v53 = vadd.f32 %v195_v30, %v127_v51  ;;  %v160_v54 = vadd.f32 %v195_v30, %v159_v52  ;;  %v225_v55 = vpop.f32.mrb[6].mxu0  ;;  %v233_v56 = vpop.f32.mrb[6].mxu1 }
  0xea   :  { %181 = vst.msk [vmem:[%s396_s3 + $0x30] sm:$0xff] %vm174_vm1, %v136_v49  ;;  %189 = vst.msk [vmem:[%s396_s3 + $0x70] sm:$0xff] %vm174_vm1, %v168_v50  ;;  %v139_v57 = vadd.f32 %v225_v55, %v195_v30  ;;  %v171_v58 = vadd.f32 %v233_v56, %v195_v30  ;;  %v130_v59 = vpop.f32.mrb[7].mxu0  ;;  %v162_v60 = vpop.f32.mrb[7].mxu1 }
  0xeb   :  { %179 = vst.msk [vmem:[%s396_s3 + $0x20] sm:$0xff] %vm174_vm1, %v128_v53  ;;  %187 = vst.msk [vmem:[%s396_s3 + $0x60] sm:$0xff] %vm174_vm1, %v160_v54  ;;  %v131_v61 = vadd.f32 %v195_v30, %v130_v59  ;;  %v163_v62 = vadd.f32 %v195_v30, %v162_v60 }
  0xec   :  { %182 = vst.msk [vmem:[%s396_s3 + $0x38] sm:$0xff] %vm174_vm1, %v139_v57  ;;  %190 = vst.msk [vmem:[%s396_s3 + $0x78] sm:$0xff] %vm174_vm1, %v171_v58 }
  0xed   :  { %180 = vst.msk [vmem:[%s396_s3 + $0x28] sm:$0xff] %vm174_vm1, %v131_v61  ;;  %188 = vst.msk [vmem:[%s396_s3 + $0x68] sm:$0xff] %vm174_vm1, %v163_v62 }

</bundles_post_ra>
